<compile_context>
chip_gen: v7x
topology: tpu7x:2x2x1
jax: 0.10.0
libtpu: 0.0.40
codegen_flags: <defaults>
</compile_context>

<pallas_src>
import functools

import jax
import jax.numpy as jnp
from jax.experimental import pallas as pl
from jax.experimental.pallas import tpu as pltpu


# ----------------------------- hardware params ------------------------------
def _hw_params():
    """Generation-aware block budget / VMEM cap / multi-TensorCore flag."""
    kind = ""
    try:
        kind = jax.devices()[0].device_kind.lower()
    except Exception:
        pass
    if "v7" in kind or "7x" in kind:
        # 64 MiB physical VMEM, 2 TCs/chip: small blocks, keep >=2 parallel steps.
        return dict(block_budget=4 << 20, vmem_cap=36 << 20, multi_tc=True)
    if "v6" in kind:
        # 128 MiB VMEM, single TC: big blocks, no megacore halving.
        return dict(block_budget=16 << 20, vmem_cap=96 << 20, multi_tc=False)
    if "v5 lite" in kind or "v5e" in kind or "v5lite" in kind:
        return dict(block_budget=16 << 20, vmem_cap=96 << 20, multi_tc=False)
    if "v5p" in kind or "v4" in kind or "v3" in kind or "v2" in kind:
        # Megacore chips: 2 cores share work via "parallel" axes.
        return dict(block_budget=12 << 20, vmem_cap=96 << 20, multi_tc=True)
    # Unknown: conservative settings that fit every generation (<= 64 MiB VMEM).
    return dict(block_budget=6 << 20, vmem_cap=32 << 20, multi_tc=False)


# --------------------------- fused single-pass -------------------------------
def _fused_kernel(x_ref, w1t_ref, w2t_ref, o_ref, *, inv_hw):
    # x_ref: (TB, C, HW); w1t: (C, Cr); w2t: (Cr, C); o_ref: (TB, C, HW)
    # Pool: cast folds into the reduction; no persistent f32 copy of the block.
    y = jnp.sum(x_ref[...].astype(jnp.float32), axis=-1) * inv_hw        # (TB, C)
    h = jnp.maximum(
        jnp.dot(y, w1t_ref[...], preferred_element_type=jnp.float32), 0.0)
    g = jax.nn.sigmoid(
        jnp.dot(h, w2t_ref[...], preferred_element_type=jnp.float32))    # (TB, C)
    # Re-read x and scale in the input dtype; only the tiny gate is cast.
    o_ref[...] = x_ref[...] * g.astype(o_ref.dtype)[:, :, None]


# ------------------------------ two-pass -------------------------------------
def _pool_gate_kernel(x_ref, w1t_ref, w2t_ref, g_ref, acc_ref, *,
                      inv_hw, hw, thw, needs_mask):
    # grid = (nb, ns); spatial reduction axis is last ("arbitrary").
    si = pl.program_id(1)

    @pl.when(si == 0)
    def _():
        acc_ref[...] = jnp.zeros_like(acc_ref)

    x = x_ref[...].astype(jnp.float32)                                   # (TB, C, THW)
    if needs_mask:
        # Zero the out-of-range tail of the last (partial) spatial block.
        col = jax.lax.broadcasted_iota(jnp.int32, x.shape, 2)
        x = jnp.where(si * thw + col < hw, x, 0.0)
    acc_ref[...] += jnp.sum(x, axis=-1)                                  # (TB, C)

    @pl.when(si == pl.num_programs(1) - 1)
    def _():
        y = acc_ref[...] * inv_hw                                        # (TB, C)
        h = jnp.maximum(
            jnp.dot(y, w1t_ref[...], preferred_element_type=jnp.float32), 0.0)
        g = jax.nn.sigmoid(
            jnp.dot(h, w2t_ref[...], preferred_element_type=jnp.float32))
        g_ref[0] = g.astype(g_ref.dtype)


def _scale_kernel(x_ref, g_ref, o_ref):
    # x_ref: (TB, C, THW); g_ref: (TB, C) (leading grid dim squeezed).
    # Multiply in the input dtype; only the tiny gate is cast.
    o_ref[...] = x_ref[...] * g_ref[...].astype(o_ref.dtype)[:, :, None]


# ------------------------------ wrapper ---------------------------------------
def channel_attention(x, w1, w2, *, block_budget_bytes=None):
    """x: (B, C, H, W). w1: (C//r, C). w2: (C, C//r). Matches the PyTorch module."""
    B, C, H, W = x.shape
    HW = H * W
    itemsize = jnp.dtype(x.dtype).itemsize

    hw = _hw_params()
    if block_budget_bytes is None:
        block_budget_bytes = hw["block_budget"]
    vmem_cap = hw["vmem_cap"]
    multi_tc = hw["multi_tc"]

    x3 = x.reshape(B, C, HW)                 # no padding: no extra HBM round trips
    w1t = w1.T.astype(jnp.float32)           # (C, Cr)
    w2t = w2.T.astype(jnp.float32)           # (Cr, C)
    Cr = w1.shape[0]
    inv_hw = 1.0 / float(HW)
    weight_bytes = int(w1t.size + w2t.size) * 4

    per_image = C * HW * itemsize

    if per_image <= block_budget_bytes:
        # ---------- fused: pool + MLP + scale, TB images per grid step ----------
        TB = min(B, max(1, block_budget_bytes // per_image))
        if multi_tc and B >= 2:
            TB = min(TB, pl.cdiv(B, 2))      # keep >=2 "parallel" steps for 2 TCs
        nb = pl.cdiv(B, TB)

        block_bytes = TB * per_image
        # in + out blocks, double-buffered, plus weights and headroom.
        vmem_limit = int(min(max(4 * block_bytes + 2 * weight_bytes + (4 << 20),
                                 16 << 20), vmem_cap))

        out3 = pl.pallas_call(
            functools.partial(_fused_kernel, inv_hw=inv_hw),
            out_shape=jax.ShapeDtypeStruct((B, C, HW), x.dtype),
            grid_spec=pltpu.PrefetchScalarGridSpec(
                num_scalar_prefetch=0,
                grid=(nb,),
                in_specs=[
                    # Last two dims equal the full array extents -> exempt from
                    # the (8, 128) block constraint; no HW padding needed.
                    pl.BlockSpec((TB, C, HW), lambda b: (b, 0, 0)),
                    pl.BlockSpec(w1t.shape, lambda b: (0, 0)),
                    pl.BlockSpec(w2t.shape, lambda b: (0, 0)),
                ],
                out_specs=pl.BlockSpec((TB, C, HW), lambda b: (b, 0, 0)),
            ),
            compiler_params=pltpu.CompilerParams(
                dimension_semantics=("parallel",),
                vmem_limit_bytes=vmem_limit),
            cost_estimate=pl.CostEstimate(
                flops=2 * B * C * HW + 4 * B * C * Cr,
                transcendentals=B * C,
                bytes_accessed=2 * B * C * HW * itemsize + weight_bytes),
        )(x3, w1t, w2t)
    else:
        # ---------- two-pass: (1) pool + gate (spatial reduction), (2) scale ----
        TB = 1                                # per-image slab already exceeds budget
        n128 = pl.cdiv(HW, 128)
        per_col = C * 128 * itemsize
        cols = int(min(n128, max(1, block_budget_bytes // per_col)))
        THW = 128 * cols
        if THW >= HW:                         # degenerate tiny-budget edge case
            THW = HW
            ns = 1
            needs_mask = False
        else:
            ns = pl.cdiv(HW, THW)
            needs_mask = (HW % THW) != 0
        nb = B

        block_bytes = TB * C * THW * itemsize
        vmem_limit = int(min(max(4 * block_bytes + 2 * weight_bytes + (4 << 20),
                                 16 << 20), vmem_cap))

        gates = pl.pallas_call(
            functools.partial(_pool_gate_kernel, inv_hw=inv_hw, hw=HW, thw=THW,
                              needs_mask=needs_mask),
            out_shape=jax.ShapeDtypeStruct((nb, TB, C), jnp.float32),
            grid_spec=pltpu.PrefetchScalarGridSpec(
                num_scalar_prefetch=0,
                grid=(nb, ns),
                in_specs=[
                    pl.BlockSpec((TB, C, THW), lambda b, s: (b, 0, s)),
                    pl.BlockSpec(w1t.shape, lambda b, s: (0, 0)),
                    pl.BlockSpec(w2t.shape, lambda b, s: (0, 0)),
                ],
                out_specs=pl.BlockSpec((1, TB, C), lambda b, s: (b, 0, 0)),
                scratch_shapes=[pltpu.VMEM((TB, C), jnp.float32)],
            ),
            compiler_params=pltpu.CompilerParams(
                dimension_semantics=("parallel", "arbitrary"),
                vmem_limit_bytes=vmem_limit),
            cost_estimate=pl.CostEstimate(
                flops=B * C * HW + 4 * B * C * Cr,
                transcendentals=B * C,
                bytes_accessed=B * C * HW * itemsize + weight_bytes + B * C * 4),
        )(x3, w1t, w2t)

        out3 = pl.pallas_call(
            _scale_kernel,
            out_shape=jax.ShapeDtypeStruct((B, C, HW), x.dtype),
            grid_spec=pltpu.PrefetchScalarGridSpec(
                num_scalar_prefetch=0,
                grid=(nb, ns),
                in_specs=[
                    pl.BlockSpec((TB, C, THW), lambda b, s: (b, 0, s)),
                    pl.BlockSpec((None, TB, C), lambda b, s: (b, 0, 0)),
                ],
                out_specs=pl.BlockSpec((TB, C, THW), lambda b, s: (b, 0, s)),
            ),
            compiler_params=pltpu.CompilerParams(
                dimension_semantics=("parallel", "parallel"),
                vmem_limit_bytes=vmem_limit),
            cost_estimate=pl.CostEstimate(
                flops=B * C * HW,
                transcendentals=0,
                bytes_accessed=2 * B * C * HW * itemsize + B * C * 4),
        )(x3, gates)

    return out3.reshape(B, C, H, W)


def channel_attention_ref(x, w1, w2):
    """Pure-JAX reference matching the PyTorch module."""
    y = jnp.mean(x, axis=(2, 3))                  # (B, C)
    h = jnp.maximum(y @ w1.T, 0.0)                # (B, C//r)
    s = jax.nn.sigmoid(h @ w2.T)                  # (B, C)
    return x * s[:, :, None, None]


if __name__ == "__main__":
    key = jax.random.PRNGKey(0)
    kx, k1, k2, kx2, k3, k4 = jax.random.split(key, 6)

    # Case 1: small module-consistent shapes -> fused single-pass path.
    B, C, H, W = 2, 32, 16, 16
    r = 4
    x = jax.random.normal(kx, (B, C, H, W), dtype=jnp.float32)
    w1 = jax.random.normal(k1, (C // r, C), dtype=jnp.float32) * 0.1
    w2 = jax.random.normal(k2, (C, C // r), dtype=jnp.float32) * 0.1

    out = jax.block_until_ready(channel_attention(x, w1, w2))
    ref = channel_attention_ref(x, w1, w2)
    assert out.shape == (B, C, H, W)
    assert jnp.allclose(out, ref, atol=1e-5, rtol=1e-5)

    # Case 2: non-128-multiple spatial size (H*W = 576) on the fused path
    # -> exercises the unpadded full-extent last dim (masked tail stores).
    B2, C2, H2, W2 = 2, 64, 24, 24
    r2 = 4
    x2 = jax.random.normal(kx2, (B2, C2, H2, W2), dtype=jnp.float32)
    w1b = jax.random.normal(k3, (C2 // r2, C2), dtype=jnp.float32) * 0.1
    w2b = jax.random.normal(k4, (C2, C2 // r2), dtype=jnp.float32) * 0.1

    out2 = jax.block_until_ready(channel_attention(x2, w1b, w2b))
    ref2 = channel_attention_ref(x2, w1b, w2b)
    assert out2.shape == (B2, C2, H2, W2)
    assert jnp.allclose(out2, ref2, atol=1e-5, rtol=1e-5)

    # Case 3: same inputs with a tiny forced block budget -> two-pass path
    # with cdiv spatial tiling and in-kernel tail masking (no padded copy).
    out3 = jax.block_until_ready(
        channel_attention(x2, w1b, w2b, block_budget_bytes=64 * 1024))
    assert out3.shape == (B2, C2, H2, W2)
    assert jnp.allclose(out3, ref2, atol=1e-5, rtol=1e-5)

    print("KERNEL_OK")
</pallas_src>

<mosaic_0001>
module attributes {stable_mosaic.version = 11 : i64} {
  func.func @_fused_kernel(%arg0: i32, %arg1: memref<2x32x256xf32, #tpu.memory_space<vmem>>, %arg2: memref<32x8xf32, #tpu.memory_space<vmem>>, %arg3: memref<8x32xf32, #tpu.memory_space<vmem>>, %arg4: memref<2x32x256xf32, #tpu.memory_space<vmem>>) attributes {dimension_semantics = [#tpu.dimension_semantics<parallel>], iteration_bounds = array<i64: 1>, scalar_prefetch = 0 : i64, scratch_operands = 0 : i64, tpu.core_type = #tpu.core_type<tc>, window_params = [{transform_indices = @transform_0, window_bounds = array<i64: 2, 32, 256>}, {pipeline_mode = #tpu.pipeline_mode<synchronous>, transform_indices = @transform_1, window_bounds = array<i64: 32, 8>}, {pipeline_mode = #tpu.pipeline_mode<synchronous>, transform_indices = @transform_2, window_bounds = array<i64: 8, 32>}, {transform_indices = @transform_3, window_bounds = array<i64: 2, 32, 256>}]} {
    %c0 = arith.constant 0 : index
    %c0_0 = arith.constant 0 : index
    %c0_1 = arith.constant 0 : index
    %0 = vector.load %arg1[%c0, %c0_0, %c0_1] : memref<2x32x256xf32, #tpu.memory_space<vmem>>, vector<2x32x256xf32>
    %cst = arith.constant dense<0.000000e+00> : vector<2x32xf32>
    %1 = vector.multi_reduction <add>, %0, %cst [2] : vector<2x32x256xf32> to vector<2x32xf32>
    %cst_2 = arith.constant 3.906250e-03 : f32
    %2 = vector.broadcast %cst_2 : f32 to vector<2x32xf32>
    %3 = arith.mulf %1, %2 : vector<2x32xf32>
    %c0_3 = arith.constant 0 : index
    %c0_4 = arith.constant 0 : index
    %4 = vector.load %arg2[%c0_3, %c0_4] : memref<32x8xf32, #tpu.memory_space<vmem>>, vector<32x8xf32>
    %cst_5 = arith.constant dense<0.000000e+00> : vector<2x8xf32>
    %5 = tpu.matmul %3, %4, %cst_5 {dimension_numbers = #tpu.dot_dimension_numbers<[1], [0], [0], [1], [0, 0, 1, 1], [], []>} : vector<2x32xf32>, vector<32x8xf32>, vector<2x8xf32> -> vector<2x8xf32>
    %cst_6 = arith.constant 0.000000e+00 : f32
    %6 = vector.broadcast %cst_6 : f32 to vector<2x8xf32>
    %7 = arith.maximumf %5, %6 : vector<2x8xf32>
    %c0_7 = arith.constant 0 : index
    %c0_8 = arith.constant 0 : index
    %8 = vector.load %arg3[%c0_7, %c0_8] : memref<8x32xf32, #tpu.memory_space<vmem>>, vector<8x32xf32>
    %cst_9 = arith.constant dense<0.000000e+00> : vector<2x32xf32>
    %9 = tpu.matmul %7, %8, %cst_9 {dimension_numbers = #tpu.dot_dimension_numbers<[1], [0], [0], [1], [0, 0, 1, 1], [], []>} : vector<2x8xf32>, vector<8x32xf32>, vector<2x32xf32> -> vector<2x32xf32>
    %10 = arith.negf %9 : vector<2x32xf32>
    %11 = math.exp %10 : vector<2x32xf32>
    %cst_10 = arith.constant 1.000000e+00 : f32
    %12 = vector.broadcast %cst_10 : f32 to vector<2x32xf32>
    %13 = arith.addf %12, %11 : vector<2x32xf32>
    %14 = arith.divf %12, %13 : vector<2x32xf32>
    %c0_11 = arith.constant 0 : index
    %c0_12 = arith.constant 0 : index
    %c0_13 = arith.constant 0 : index
    %15 = vector.load %arg1[%c0_11, %c0_12, %c0_13] : memref<2x32x256xf32, #tpu.memory_space<vmem>>, vector<2x32x256xf32>
    %16 = vector.shape_cast %14 : vector<2x32xf32> to vector<2x32x1xf32>
    %17 = vector.broadcast %16 : vector<2x32x1xf32> to vector<2x32x256xf32>
    %18 = arith.mulf %15, %17 : vector<2x32x256xf32>
    %c0_14 = arith.constant 0 : index
    %c0_15 = arith.constant 0 : index
    %c0_16 = arith.constant 0 : index
    %19 = vector.load %arg4[%c0_14, %c0_15, %c0_16] : memref<2x32x256xf32, #tpu.memory_space<vmem>>, vector<2x32x256xf32>
    tpu.vector_store %arg4[%c0_14, %c0_15, %c0_16], %18 {strides = array<i32>} : memref<2x32x256xf32, #tpu.memory_space<vmem>>, vector<2x32x256xf32>,
    return
  }
  func.func @transform_0(%arg0: i32) -> (i32, i32, i32) {
    %c0_i32 = arith.constant 0 : i32
    %c0_i32_0 = arith.constant 0 : i32
    %c0_i32_1 = arith.constant 0 : i32
    return %arg0, %c0_i32, %c0_i32_0 : i32, i32, i32
  }
  func.func @transform_1(%arg0: i32) -> (i32, i32) {
    %c0_i32 = arith.constant 0 : i32
    %c0_i32_0 = arith.constant 0 : i32
    %c0_i32_1 = arith.constant 0 : i32
    return %c0_i32, %c0_i32_0 : i32, i32
  }
  func.func @transform_2(%arg0: i32) -> (i32, i32) {
    %c0_i32 = arith.constant 0 : i32
    %c0_i32_0 = arith.constant 0 : i32
    %c0_i32_1 = arith.constant 0 : i32
    return %c0_i32, %c0_i32_0 : i32, i32
  }
  func.func @transform_3(%arg0: i32) -> (i32, i32, i32) {
    %c0_i32 = arith.constant 0 : i32
    %c0_i32_0 = arith.constant 0 : i32
    %c0_i32_1 = arith.constant 0 : i32
    return %arg0, %c0_i32, %c0_i32_0 : i32, i32, i32
  }
}

</mosaic_0001>

<bundles_post_ra>
// kernel: tpu_custom_call.1
= control target key start
LH: loop header
LB: loop body
LE: loop exit
PB: predicated region body
PF: predicated region fallthrough
CT: control target
= control target key end

     0   :  { %8 = vsyncpa [#allocation3], 0  ;;  %s606_s0 = inlined_call_operand.hbm [shape: f32[2,32,256], index: 0, kind: input, shape index: {}]   ;;  %s607_s1 = inlined_call_operand.vmem [shape: f32[32,8], index: 1, kind: input, shape index: {}]   ;;  %s608_s2 = inlined_call_operand.vmem [shape: f32[8,32], index: 2, kind: input, shape index: {}]   ;;  %s609_s3 = inlined_call_operand.hbm [shape: f32[2,32,256], index: 3, kind: output, shape index: {}]  }
   0x1   :  { %9 = vsyncpa [#allocation4], 0  ;;  %s470_s12 = smov [#allocation2]   ;;  %s422_s16 = scalar_lea.hbm %s606_s0, 2048 }
   0x2   :  { %s15_s13 = sshll.u32 %s470_s12, 4  ;;  %p423_p0 = scmp.ne.s32.totalorder %s606_s0, %s422_s16  ;;  %s16_s13 = int_to_ptr.vmem [resolvable:$true] %s15_s13 }
   0x3   :  { %p426_p1 = scmp.lt.u32.totalorder %s422_s16, %s606_s0 }
   0x5   :  { %p428_p2 = pnand %p426_p1, %p423_p0 }
   0x7   :  { %431 = shalt.err (!%p428_p2)
}
   0x8   :  { %s432_s21 = scalar_lea.vmem %s16_s13, 2048  ;;  %p437_p4 = scmp.lt.s32.totalorder %s16_s13, %s16_s13 }
   0x9   :  { %p433_p3 = scmp.ne.s32.totalorder %s16_s13, %s432_s21  ;;  %p438_p5 = scmp.lt.s32.totalorder %s432_s21, %s432_s21 }
   0xb   :  { %p439_p6 = por %p438_p5, %p437_p4 }
   0xd   :  { %p440_p7 = pnand %p439_p6, %p433_p3 }
   0xf   :  { %443 = shalt.err (!%p440_p7)
}
  0x10   :  { %s471_s22 = smov 256   ;;  %s472_s23 = smov 16  }
  0x11   :  { %21 = dma.hbm_to_vmem [thread:$0]  %s606_s0, 2048, %s16_s13, [#allocation3], %s471_s22, %s471_s22, %s472_s23  }
  0x12   :  { %466 = dma.done.wait [#allocation3], 2048  }
  0x13   :  { %467 = vsyncadd [#allocation3], 4294965248  ;;  %v512_v0 = vld [vmem:[#allocation2 + $0x40] sm:$0xff]  ;;  %v514_v1 = vld [vmem:[#allocation2 + $0x48] sm:$0xff]  ;;  %v473_v27 = vmov 0.0|0.0   ;;  %vm474_vm0 = vmmov 0   ;;  %v89_v32 = vlaneseq }
  0x14   :  { %v516_v2 = vld [vmem:[#allocation2] sm:$0xff]  ;;  %v57_v3 = vadd.f32 %v514_v1, %v512_v0  ;;  %v520_v4 = vld [vmem:[#allocation2 + $0x8] sm:$0xff]  ;;  %v522_v5 = vld [vmem:[#allocation2 + $0x50] sm:$0xff]  ;;  %405 = vmatprep.subr.bf16.mxu0 %v473_v27  ;;  %v475_v31 = vmov 0.0   ;;  %vm100_vm1 = vcmask 130112   ;;  %vm107_vm2 = vcmask 195712  }
  0x15   :  { %v524_v6 = vld [vmem:[#allocation2 + $0x58] sm:$0xff]  ;;  %v45_v7 = vadd.f32 %v520_v4, %v516_v2  ;;  %v528_v8 = vld [vmem:[#allocation2 + $0x10] sm:$0xff]  ;;  %v536_v12 = vld [vmem:[#allocation2 + $0x60] sm:$0xff]  ;;  %397 = vmatprep.mubr.msk.f32.mxu0 %vm474_vm0, %v475_v31  ;;  %400 = vmatprep.subr.mxu1 %v475_v31  ;;  %v90_v34 = vand.u32 127, %v89_v32  ;;  %v92_v39 = vshrl.u32 %v89_v32, 7  ;;  %vm114_vm3 = vcmask 261312  }
  0x16   :  { %v530_v9 = vld [vmem:[#allocation2 + $0x18] sm:$0xff]  ;;  %58 = vadd.xlane.f32.xlu1 %v57_v3  ;;  %v60_v10 = vadd.f32 %v524_v6, %v522_v5  ;;  %v538_v13 = vld [vmem:[#allocation2 + $0x68] sm:$0xff]  ;;  %v540_v14 = vld [vmem:[#allocation2 + $0x20] sm:$0xff]  ;;  %402 = vmatprep.mubr.msk.f32.mxu1 %vm474_vm0, %v475_v31  ;;  %vm135_vm4 = vcmask 1041409   ;;  %vm137_vm5 = vcmask 261120   ;;  %vm212_vm6 = vcmask 64512  }
  0x17   :  { %46 = vadd.xlane.f32.xlu0 %v45_v7  ;;  %v48_v11 = vadd.f32 %v530_v9, %v528_v8  ;;  %v542_v15 = vld [vmem:[#allocation2 + $0x28] sm:$0xff]  ;;  %v63_v16 = vadd.f32 %v538_v13, %v536_v12  ;;  %v548_v18 = vld [vmem:[#allocation2 + $0x70] sm:$0xff]  ;;  %v550_v19 = vld [vmem:[#allocation2 + $0x78] sm:$0xff]  ;;  %v95_v36 = vadd.s32 4294967288, %v90_v34  ;;  %v102_v38 = vadd.s32 4294967280, %v90_v34 }
  0x18   :  { %v51_v17 = vadd.f32 %v542_v15, %v540_v14  ;;  %v552_v20 = vld [vmem:[#allocation2 + $0x30] sm:$0xff]  ;;  %v554_v21 = vld [vmem:[#allocation2 + $0x38] sm:$0xff]  ;;  %v66_v22 = vadd.f32 %v550_v19, %v548_v18  ;;  %v77_v24 = vld [vmem:[%s607_s1] sm:$0xff]  ;;  %v109_v43 = vadd.s32 4294967272, %v90_v34  ;;  %v93_v47 = vsub.s32 %v90_v34, %v92_v39 }
  0x19   :  { %v54_v23 = vadd.f32 %v554_v21, %v552_v20  ;;  %v78_v25 = vld [vmem:[%s607_s1 + $0x8] sm:$0xff]  ;;  %v79_v28 = vld [vmem:[%s607_s1 + $0x10] sm:$0xff]  ;;  %v80_v29 = vld [vmem:[%s607_s1 + $0x18] sm:$0xff]  ;;  %v98_v41 = vsub.s32 %v95_v36, %v92_v39  ;;  %v105_v45 = vsub.s32 %v102_v38, %v92_v39  ;;  %v294_v34 = vsub.s32 0, %v92_v39 }
  0x1a   :  { %61 = vadd.xlane.f32.xlu1 %v60_v10  ;;  %v406_v26 = vpack.c.bf16 %v78_v25, %v77_v24  ;;  %v409_v30 = vpack.c.bf16 %v80_v29, %v79_v28  ;;  %v112_v54 = vsub.s32 %v109_v43, %v92_v39  ;;  %v211_v25 = vld [vmem:[%s608_s2] sm:$0xff]  ;;  %s476_s2 = smov [#allocation5]  }
  0x1b   :  { %49 = vadd.xlane.f32.xlu0 %v48_v11  ;;  %401 = vmatpush3.msra.mxu1 %v211_v25  ;;  %s367_s7 = sshll.u32 %s476_s2, 4  ;;  %s368_s7 = int_to_ptr.vmem [resolvable:$true] %s367_s7 }
  0x1c   :  { %407 = vmatpush3.bf16.msra.mxu0 %v406_v26  ;;  %s444_s8 = scalar_lea.vmem %s368_s7, 2048  ;;  %p449_p9 = scmp.lt.s32.totalorder %s368_s7, %s368_s7 }
  0x1d   :  { %408 = vmatprep.subr.bf16.mxu0 %v473_v27  ;;  %p445_p8 = scmp.ne.s32.totalorder %s368_s7, %s444_s8  ;;  %p450_p10 = scmp.lt.s32.totalorder %s444_s8, %s444_s8 }
  0x1e   :  { %64 = vadd.xlane.f32.xlu1 %v63_v16 }
  0x1f   :  { %52 = vadd.xlane.f32.xlu0 %v51_v17  ;;  %p451_p11 = por %p450_p10, %p449_p9 }
  0x20   :  { %410 = vmatpush3.bf16.msra.mxu0 %v409_v30 }
  0x21   :  { %p452_p12 = pnand %p451_p11, %p445_p8 }
  0x22   :  { %67 = vadd.xlane.f32.xlu1 %v66_v22 }
  0x23   :  { %55 = vadd.xlane.f32.xlu0 %v54_v23 }
  0xa3   :  { %v59_v33 = vpop.xlane.xlu1 %58 }
  0xa4   :  { %v47_v35 = vpop.xlane.xlu0 %46  ;;  %v73_v48 = vmul.f32 0.00390625, %v59_v33 }
  0xa5   :  { %v69_v51 = vmul.f32 0.00390625, %v47_v35 }
  0xa6   :  { %v119_v58 = vrot.slane %v73_v48, %v93_v47 }
  0xa7   :  { %v62_v37 = vpop.xlane.xlu1 %61  ;;  %v94_v62 = vrot.slane %v69_v51, %v93_v47 }
  0xa8   :  { %v50_v40 = vpop.xlane.xlu0 %49  ;;  %v74_v42 = vmul.f32 0.00390625, %v62_v37  ;;  %v313_v37 = vsub.s32 1, %v92_v39 }
  0xa9   :  { %v70_v44 = vmul.f32 0.00390625, %v50_v40 }
  0xaa   :  { %v123_v53 = vrot.slane %v74_v42, %v98_v41 }
  0xab   :  { %v65_v46 = vpop.xlane.xlu1 %64  ;;  %v99_v55 = vrot.slane %v70_v44, %v98_v41 }
  0xac   :  { %v75_v49 = vmul.f32 0.00390625, %v65_v46  ;;  %v53_v50 = vpop.xlane.xlu0 %52  ;;  %v124_v3 = vsel %vm100_vm1, %v123_v53, %v119_v58 }
  0xad   :  { %v71_v52 = vmul.f32 0.00390625, %v53_v50  ;;  %v101_v10 = vsel %vm100_vm1, %v99_v55, %v94_v62 }
  0xae   :  { %v128_v56 = vrot.slane %v75_v49, %v105_v45 }
  0xaf   :  { %v68_v57 = vpop.xlane.xlu1 %67  ;;  %v106_v59 = vrot.slane %v71_v52, %v105_v45 }
  0xb0   :  { %v76_v60 = vmul.f32 0.00390625, %v68_v57  ;;  %v56_v61 = vpop.xlane.xlu0 %55  ;;  %v129_v11 = vsel %vm107_vm2, %v128_v56, %v124_v3 }
  0xb1   :  { %v72_v63 = vmul.f32 0.00390625, %v56_v61  ;;  %v108_v17 = vsel %vm107_vm2, %v106_v59, %v101_v10 }
  0xb2   :  { %v133_v7 = vrot.slane %v76_v60, %v112_v54 }
  0xb3   :  { %v113_v16 = vrot.slane %v72_v63, %v112_v54 }
  0xb4   :  { %v134_v22 = vsel %vm114_vm3, %v133_v7, %v129_v11 }
  0xb5   :  { %v115_v23 = vsel %vm114_vm3, %v113_v16, %v108_v17 }
  0xb6   :  { %v136_v24 = vsel %vm135_vm4, %v134_v22, %v115_v23 }
  0xb7   :  { %398 = vmatmul.mubr.msk.f32.vlgmr.msra.gmra.mrb[0].mxu0 %vm137_vm5, %v136_v24 }
 0x18a   :  { %v206_v26 = vpop.f32.mrb[0].mxu0 }
 0x18b   :  { %v210_v27 = vmax.f32 %v206_v26, 0.0  ;;  %v399_v28 = vpop.f32.mrb[1].mxu0 }
 0x18d   :  { %403 = vmatmul.mubr.msk.f32.vlgmr.msra.gmra.mrb[0].mxu1 %vm212_vm6, %v210_v27 }
 0x260   :  { %v282_v29 = vpop.f32.mrb[0].mxu1 }
 0x261   :  { %v381_v30 = vmul.f32 -1.442695, %v282_v29  ;;  %v404_v31 = vpop.f32.mrb[1].mxu1 }
 0x263   :  { %418 = vpow2.f32 %v381_v30 }
 0x26d   :  { %v419_v32 = vpop.eup %418 }
 0x26e   :  { %v289_v33 = vadd.f32 1.0, %v419_v32 }
 0x270   :  { %420 = vrcp.f32 %v289_v33 }
 0x27a   :  { %v421_v35 = vpop.eup %420 }
 0x27b   :  { %v295_v36 = vrot.slane %v421_v35, %v294_v34  ;;  %v314_v38 = vrot.slane %v421_v35, %v313_v37 }
 0x27d   :  { %301 = vbcast.lane.b32.xlu1 %v295_v36, 264  ;;  %297 = vbcast.lane.b32.xlu0 %v295_v36, 256 }
 0x281   :  { %305 = vbcast.lane.b32.xlu1 %v295_v36, 272  ;;  %316 = vbcast.lane.b32.xlu0 %v314_v38, 256 }
 0x285   :  { %309 = vbcast.lane.b32.xlu1 %v295_v36, 280  ;;  %324 = vbcast.lane.b32.xlu0 %v314_v38, 272 }
 0x289   :  { %320 = vbcast.lane.b32.xlu1 %v314_v38, 264 }
 0x28d   :  { %328 = vbcast.lane.b32.xlu1 %v314_v38, 280 }
 0x2ef   :  { %v302_v40 = vpop.permute.xlu1 %301  ;;  %v298_v41 = vpop.permute.xlu0 %297 }
 0x2f0   :  { %v332_v42 = vmul.f32 %v302_v40, %v528_v8  ;;  %v333_v43 = vmul.f32 %v302_v40, %v530_v9  ;;  %v330_v44 = vmul.f32 %v298_v41, %v516_v2  ;;  %v331_v45 = vmul.f32 %v298_v41, %v520_v4 }
 0x2f2   :  { %348 = vst [vmem:[#allocation5 + $0x10] sm:$0xff] %v332_v42  ;;  %349 = vst [vmem:[#allocation5 + $0x18] sm:$0xff] %v333_v43 }
 0x2f3   :  { %346 = vst [vmem:[#allocation5] sm:$0xff] %v330_v44  ;;  %347 = vst [vmem:[#allocation5 + $0x8] sm:$0xff] %v331_v45  ;;  %v306_v39 = vpop.permute.xlu1 %305  ;;  %v317_v46 = vpop.permute.xlu0 %316 }
 0x2f4   :  { %v334_v47 = vmul.f32 %v306_v39, %v540_v14  ;;  %v335_v48 = vmul.f32 %v306_v39, %v542_v15  ;;  %v338_v49 = vmul.f32 %v317_v46, %v512_v0  ;;  %v339_v8 = vmul.f32 %v317_v46, %v514_v1 }
 0x2f6   :  { %350 = vst [vmem:[#allocation5 + $0x20] sm:$0xff] %v334_v47  ;;  %351 = vst [vmem:[#allocation5 + $0x28] sm:$0xff] %v335_v48 }
 0x2f7   :  { %354 = vst [vmem:[#allocation5 + $0x40] sm:$0xff] %v338_v49  ;;  %355 = vst [vmem:[#allocation5 + $0x48] sm:$0xff] %v339_v8  ;;  %v310_v2 = vpop.permute.xlu1 %309  ;;  %v325_v4 = vpop.permute.xlu0 %324 }
 0x2f8   :  { %v336_v9 = vmul.f32 %v310_v2, %v552_v20  ;;  %v337_v50 = vmul.f32 %v310_v2, %v554_v21  ;;  %v342_v51 = vmul.f32 %v325_v4, %v536_v12  ;;  %v343_v14 = vmul.f32 %v325_v4, %v538_v13 }
 0x2fa   :  { %352 = vst [vmem:[#allocation5 + $0x30] sm:$0xff] %v336_v9  ;;  %353 = vst [vmem:[#allocation5 + $0x38] sm:$0xff] %v337_v50 }
 0x2fb   :  { %358 = vst [vmem:[#allocation5 + $0x60] sm:$0xff] %v342_v51  ;;  %359 = vst [vmem:[#allocation5 + $0x68] sm:$0xff] %v343_v14  ;;  %v321_v0 = vpop.permute.xlu1 %320 }
 0x2fc   :  { %v340_v1 = vmul.f32 %v321_v0, %v522_v5  ;;  %v341_v15 = vmul.f32 %v321_v0, %v524_v6 }
 0x2fe   :  { %356 = vst [vmem:[#allocation5 + $0x50] sm:$0xff] %v340_v1  ;;  %357 = vst [vmem:[#allocation5 + $0x58] sm:$0xff] %v341_v15 }
 0x2ff   :  { %v329_v20 = vpop.permute.xlu1 %328 }
 0x300   :  { %v344_v21 = vmul.f32 %v329_v20, %v548_v18  ;;  %v345_v12 = vmul.f32 %v329_v20, %v550_v19 }
 0x302   :  { %360 = vst [vmem:[#allocation5 + $0x70] sm:$0xff] %v344_v21  ;;  %361 = vst [vmem:[#allocation5 + $0x78] sm:$0xff] %v345_v12 }
 0x303   :  { %455 = shalt.err (!%p452_p12)
}
 0x304   :  { %s456_s11 = scalar_lea.hbm %s609_s3, 2048 }
 0x305   :  { %p457_p13 = scmp.ne.s32.totalorder %s609_s3, %s456_s11  ;;  %p460_p0 = scmp.lt.u32.totalorder %s456_s11, %s609_s3 }
 0x307   :  { %p462_p1 = pnand %p460_p0, %p457_p13 }
 0x309   :  { %465 = shalt.err (!%p462_p1)
}
 0x30a   :  { %373 = dma.vmem_to_hbm [thread:$0]  %s368_s7, 2048, %s609_s3, [#allocation4], %s471_s22, %s471_s22, %s472_s23  }
 0x30b   :  { %468 = dma.done.wait [#allocation4], 2048  }
 0x30c   :  { %469 = vsyncadd [#allocation4], 4294965248 }
 0x30d   :  { %377 = vsyncpa [#allocation3], 1 }
 0x30e   :  { %378 = vsyncpa [#allocation4], 1 }

</bundles_post_ra>
